<compile_context>
chip_gen: v7x
topology: tpu7x:2x2x1
jax: 0.10.0
libtpu: 0.0.40
codegen_flags: <defaults>
</compile_context>

<pallas_src>
import functools
import math

import jax
import jax.numpy as jnp
from jax.experimental import pallas as pl
from jax.experimental.pallas import tpu as pltpu


def _mean_pool_conv_kernel(x_ref, w_ref, b_ref, o_ref, *, td, rows, wq, spad):
    # x_ref: (1, TD*rows, Spad)  rows = 4*Cin (pool-phase major, Cin minor); Spad = the
    #                            flattened zero-padded pooled plane (Hq*Wq) padded to 128.
    # w_ref: (Cout, 9*rows)      conv weight with the 0.25 pooling factor folded in,
    #                            (dh, dw) tap major, (phase, Cin) minor.
    # b_ref: (Cout, Spad)        bias, pre-broadcast on the host (hoisted out of the loop).
    # o_ref: (1, Cout, TD*Spad)  depth slice t occupies lanes [t*Spad, (t+1)*Spad).
    x = x_ref[0]            # (TD*rows, Spad)
    w = w_ref[...]          # (Cout, 9*rows)
    bias = b_ref[...]       # (Cout, Spad)

    # 9 conv taps = lane rotations of the flattened padded plane, hoisted out of the
    # per-depth loop: one XLU roll per tap over the full block.
    # CONTRACT: wrap-around / lane-tail junk only ever lands in the halo rows/cols or the
    # zero lane tail, which the wrapper discards via [:, :, :d, :s] and [..., 1:-1, 1:-1].
    taps = []
    for dh in range(3):
        for dw in range(3):
            off = (dh - 1) * wq + (dw - 1)
            shift = (-off) % spad
            taps.append(x if shift == 0 else pltpu.roll(x, shift=shift, axis=1))

    # One K = 9*rows matmul per depth slice; weight stays resident, output stores are
    # lane-dense (aligned, unmasked) (Cout, Spad) slabs.
    for t in range(td):
        lo = t * rows
        patch = jnp.concatenate([tp[lo:lo + rows] for tp in taps], axis=0)  # (9*rows, Spad)
        acc = jnp.dot(w, patch, preferred_element_type=jnp.float32)          # (Cout, Spad)
        o_ref[0, :, t * spad:(t + 1) * spad] = (acc + bias).astype(o_ref.dtype)


@jax.jit
def mean_pool_conv_forward(x, weight, bias):
    """Forward of `mean_pool_conv`: AvgPool3d((1,2,2)) then Conv3d (1,3,3), pad (0,1,1).

    x: (N, Cin, D, H, W) float32 (PyTorch NCDHW).
    weight: (Cout, Cin, 1, 3, 3), bias: (Cout,).
    Returns (N, Cout, D, H//2, W//2)."""
    n, cin, d, h, w = x.shape
    cout = weight.shape[0]
    assert weight.shape == (cout, cin, 1, 3, 3), "conv kernel must be (1, 3, 3)"

    hp, wp = h // 2, w // 2                 # AvgPool3d floor semantics (odd H/W handled)
    hq, wq = hp + 2, wp + 2                 # pooled plane + 1-pixel conv zero halo
    s = hq * wq
    spad = -(-s // 128) * 128               # lane-dense flattened plane
    rows = 4 * cin                          # pooling phases merged onto sublanes

    # ---- tile / grid selection ----
    slice_bytes = rows * spad * 4
    td = max(1, min(d, (1 << 20) // max(slice_bytes, 1)))   # ~1 MB input blocks
    while td > 1 and n * (-(-d // td)) < 4:                  # keep >= 4 grid steps
        td = (td + 1) // 2
    mult = 8 // math.gcd(rows, 8)            # (8,128) tiling of the input block rows
    td = -(-td // mult) * mult
    d_pad = -(-d // td) * td
    grid = (n, d_pad // td)

    # ---- host glue: one pad + one transpose + lane-tail pad ----
    # A pre-pool pad of 2 on H/W pools to exactly the 1-pixel zero halo of the pooled
    # plane (= conv padding (1,1)); the D pad covers the last (partial) depth block.
    xs = x[:, :, :, :2 * hp, :2 * wp]                        # floor for odd H/W
    xp = jnp.pad(xs, ((0, 0), (0, 0), (0, d_pad - d), (2, 2), (2, 2)))
    xr = xp.reshape(n, cin, d_pad, hq, 2, wq, 2)
    xr = jnp.transpose(xr, (0, 2, 4, 6, 1, 3, 5))            # (n, d_pad, 2, 2, cin, hq, wq)
    xr = xr.reshape(n, d_pad * rows, s)
    xr = jnp.pad(xr, ((0, 0), (0, 0), (0, spad - s)))        # zero lane tail

    # Conv weight (Cout, Cin, 1, 3, 3) -> (Cout, 9*4*Cin): (dh, dw) tap major, then the
    # 4 pooling phases (each weighted 0.25 = folded AvgPool), Cin minor.
    wk = jnp.transpose(weight[:, :, 0, :, :], (0, 2, 3, 1))  # (Cout, 3, 3, Cin)
    wk = jnp.broadcast_to(wk.reshape(cout, 9, 1, cin), (cout, 9, 4, cin)) * 0.25
    wmat = wk.reshape(cout, 9 * rows)
    bmat = jnp.broadcast_to(bias.reshape(cout, 1), (cout, spad))

    # ---- VMEM sizing (v7x has only 64 MiB) ----
    in_block = td * rows * spad * 4
    out_block = cout * td * spad * 4
    interm = 9 * in_block + 9 * rows * spad * 4 + 2 * cout * spad * 4
    vmem_need = 2 * (in_block + out_block) + cout * 9 * rows * 4 + cout * spad * 4 + interm
    vmem_limit = int(min(max(vmem_need + (2 << 20), 8 << 20), 48 << 20))

    out = pl.pallas_call(
        functools.partial(_mean_pool_conv_kernel, td=td, rows=rows, wq=wq, spad=spad),
        out_shape=jax.ShapeDtypeStruct((n, cout, d_pad * spad), x.dtype),
        grid=grid,
        in_specs=[
            pl.BlockSpec((1, td * rows, spad), lambda ni, di: (ni, di, 0)),
            pl.BlockSpec((cout, 9 * rows), lambda ni, di: (0, 0)),
            pl.BlockSpec((cout, spad), lambda ni, di: (0, 0)),
        ],
        out_specs=pl.BlockSpec((1, cout, td * spad), lambda ni, di: (ni, 0, di)),
        compiler_params=pltpu.CompilerParams(
            dimension_semantics=("parallel", "parallel"),
            vmem_limit_bytes=vmem_limit,
        ),
    )(xr, wmat, bmat)

    # (N, Cout, D_pad*Spad) -> interior (N, Cout, D, Hp, Wp).  No output transpose.
    out = out.reshape(n, cout, d_pad, spad)[:, :, :d, :s]
    out = out.reshape(n, cout, d, hq, wq)[:, :, :, 1:-1, 1:-1]
    return out


def _reference_forward(x, weight, bias):
    """Pure-JAX reference of the PyTorch module."""
    n, cin, d, h, w = x.shape
    hp, wp = h // 2, w // 2
    xs = x[:, :, :, :2 * hp, :2 * wp]
    pooled = xs.reshape(n, cin, d, hp, 2, wp, 2).mean(axis=(4, 6))
    out = jax.lax.conv_general_dilated(
        pooled, weight,
        window_strides=(1, 1, 1),
        padding=((0, 0), (1, 1), (1, 1)),
        dimension_numbers=("NCDHW", "OIDHW", "NCDHW"),
    )
    return out + bias[None, :, None, None, None]


if __name__ == "__main__":
    # Small shapes consistent with the module: N=2, Cin=4, Cout=8, D=3, H=W=16.
    N, Cin, Cout, D, H, W = 2, 4, 8, 3, 16, 16

    key = jax.random.PRNGKey(0)
    kx, kw, kb = jax.random.split(key, 3)
    x = jax.random.normal(kx, (N, Cin, D, H, W), jnp.float32)
    weight = jax.random.normal(kw, (Cout, Cin, 1, 3, 3), jnp.float32) * 0.1
    bias = jax.random.normal(kb, (Cout,), jnp.float32) * 0.1

    out = jax.block_until_ready(mean_pool_conv_forward(x, weight, bias))
    ref = jax.block_until_ready(_reference_forward(x, weight, bias))

    assert out.shape == (N, Cout, D, H // 2, W // 2), out.shape
    assert jnp.allclose(out, ref, atol=1e-4, rtol=1e-4), float(jnp.max(jnp.abs(out - ref)))

    print("KERNEL_OK")
</pallas_src>

<mosaic_0001>
module attributes {stable_mosaic.version = 11 : i64} {
  func.func @_mean_pool_conv_kernel(%arg0: i32, %arg1: i32, %arg2: memref<1x32x128xf32, #tpu.memory_space<vmem>>, %arg3: memref<8x144xf32, #tpu.memory_space<vmem>>, %arg4: memref<8x128xf32, #tpu.memory_space<vmem>>, %arg5: memref<1x8x256xf32, #tpu.memory_space<vmem>>) attributes {dimension_semantics = [#tpu.dimension_semantics<parallel>, #tpu.dimension_semantics<parallel>], iteration_bounds = array<i64: 2, 2>, scalar_prefetch = 0 : i64, scratch_operands = 0 : i64, tpu.core_type = #tpu.core_type<tc>, window_params = [{transform_indices = @transform_0, window_bounds = array<i64: 1, 32, 128>}, {pipeline_mode = #tpu.pipeline_mode<synchronous>, transform_indices = @transform_1, window_bounds = array<i64: 8, 144>}, {pipeline_mode = #tpu.pipeline_mode<synchronous>, transform_indices = @transform_2, window_bounds = array<i64: 8, 128>}, {transform_indices = @transform_3, window_bounds = array<i64: 1, 8, 256>}]} {
    %c0 = arith.constant 0 : index
    %c0_0 = arith.constant 0 : index
    %c0_1 = arith.constant 0 : index
    %0 = vector.load %arg2[%c0, %c0_0, %c0_1] : memref<1x32x128xf32, #tpu.memory_space<vmem>>, vector<1x32x128xf32>
    %1 = vector.shape_cast %0 : vector<1x32x128xf32> to vector<32x128xf32>
    %c0_2 = arith.constant 0 : index
    %c0_3 = arith.constant 0 : index
    %2 = vector.load %arg3[%c0_2, %c0_3] : memref<8x144xf32, #tpu.memory_space<vmem>>, vector<8x144xf32>
    %c0_4 = arith.constant 0 : index
    %c0_5 = arith.constant 0 : index
    %3 = vector.load %arg4[%c0_4, %c0_5] : memref<8x128xf32, #tpu.memory_space<vmem>>, vector<8x128xf32>
    %c11_i32 = arith.constant 11 : i32
    %4 = tpu.dynamic_rotate %1 by %c11_i32 dim 1 : vector<32x128xf32>, i32 -> vector<32x128xf32>
    %c10_i32 = arith.constant 10 : i32
    %5 = tpu.dynamic_rotate %1 by %c10_i32 dim 1 : vector<32x128xf32>, i32 -> vector<32x128xf32>
    %c9_i32 = arith.constant 9 : i32
    %6 = tpu.dynamic_rotate %1 by %c9_i32 dim 1 : vector<32x128xf32>, i32 -> vector<32x128xf32>
    %c1_i32 = arith.constant 1 : i32
    %7 = tpu.dynamic_rotate %1 by %c1_i32 dim 1 : vector<32x128xf32>, i32 -> vector<32x128xf32>
    %c127_i32 = arith.constant 127 : i32
    %8 = tpu.dynamic_rotate %1 by %c127_i32 dim 1 : vector<32x128xf32>, i32 -> vector<32x128xf32>
    %c119_i32 = arith.constant 119 : i32
    %9 = tpu.dynamic_rotate %1 by %c119_i32 dim 1 : vector<32x128xf32>, i32 -> vector<32x128xf32>
    %c118_i32 = arith.constant 118 : i32
    %10 = tpu.dynamic_rotate %1 by %c118_i32 dim 1 : vector<32x128xf32>, i32 -> vector<32x128xf32>
    %c117_i32 = arith.constant 117 : i32
    %11 = tpu.dynamic_rotate %1 by %c117_i32 dim 1 : vector<32x128xf32>, i32 -> vector<32x128xf32>
    %12 = vector.extract_strided_slice %4 {offsets = [0, 0], sizes = [16, 128], strides = [1, 1]} : vector<32x128xf32> to vector<16x128xf32>
    %13 = vector.extract_strided_slice %5 {offsets = [0, 0], sizes = [16, 128], strides = [1, 1]} : vector<32x128xf32> to vector<16x128xf32>
    %14 = vector.extract_strided_slice %6 {offsets = [0, 0], sizes = [16, 128], strides = [1, 1]} : vector<32x128xf32> to vector<16x128xf32>
    %15 = vector.extract_strided_slice %7 {offsets = [0, 0], sizes = [16, 128], strides = [1, 1]} : vector<32x128xf32> to vector<16x128xf32>
    %16 = vector.extract_strided_slice %1 {offsets = [0, 0], sizes = [16, 128], strides = [1, 1]} : vector<32x128xf32> to vector<16x128xf32>
    %17 = vector.extract_strided_slice %8 {offsets = [0, 0], sizes = [16, 128], strides = [1, 1]} : vector<32x128xf32> to vector<16x128xf32>
    %18 = vector.extract_strided_slice %9 {offsets = [0, 0], sizes = [16, 128], strides = [1, 1]} : vector<32x128xf32> to vector<16x128xf32>
    %19 = vector.extract_strided_slice %10 {offsets = [0, 0], sizes = [16, 128], strides = [1, 1]} : vector<32x128xf32> to vector<16x128xf32>
    %20 = vector.extract_strided_slice %11 {offsets = [0, 0], sizes = [16, 128], strides = [1, 1]} : vector<32x128xf32> to vector<16x128xf32>
    %21 = tpu.concatenate %12, %13, %14, %15, %16, %17, %18, %19, %20 in 0 : vector<16x128xf32>, vector<16x128xf32>, vector<16x128xf32>, vector<16x128xf32>, vector<16x128xf32>, vector<16x128xf32>, vector<16x128xf32>, vector<16x128xf32>, vector<16x128xf32> -> vector<144x128xf32>
    %cst = arith.constant dense<0.000000e+00> : vector<8x128xf32>
    %22 = tpu.matmul %2, %21, %cst {dimension_numbers = #tpu.dot_dimension_numbers<[1], [0], [0], [1], [0, 0, 1, 1], [], []>} : vector<8x144xf32>, vector<144x128xf32>, vector<8x128xf32> -> vector<8x128xf32>
    %23 = arith.addf %22, %3 : vector<8x128xf32>
    %c0_6 = arith.constant 0 : index
    %c0_7 = arith.constant 0 : index
    %c0_8 = arith.constant 0 : index
    %24 = vector.load %arg5[%c0_6, %c0_7, %c0_8] : memref<1x8x256xf32, #tpu.memory_space<vmem>>, vector<1x8x128xf32>
    %25 = vector.shape_cast %24 : vector<1x8x128xf32> to vector<8x128xf32>
    %26 = vector.shape_cast %23 : vector<8x128xf32> to vector<1x8x128xf32>
    tpu.vector_store %arg5[%c0_6, %c0_7, %c0_8], %26 {strides = array<i32>} : memref<1x8x256xf32, #tpu.memory_space<vmem>>, vector<1x8x128xf32>,
    %27 = vector.extract_strided_slice %4 {offsets = [16, 0], sizes = [16, 128], strides = [1, 1]} : vector<32x128xf32> to vector<16x128xf32>
    %28 = vector.extract_strided_slice %5 {offsets = [16, 0], sizes = [16, 128], strides = [1, 1]} : vector<32x128xf32> to vector<16x128xf32>
    %29 = vector.extract_strided_slice %6 {offsets = [16, 0], sizes = [16, 128], strides = [1, 1]} : vector<32x128xf32> to vector<16x128xf32>
    %30 = vector.extract_strided_slice %7 {offsets = [16, 0], sizes = [16, 128], strides = [1, 1]} : vector<32x128xf32> to vector<16x128xf32>
    %31 = vector.extract_strided_slice %1 {offsets = [16, 0], sizes = [16, 128], strides = [1, 1]} : vector<32x128xf32> to vector<16x128xf32>
    %32 = vector.extract_strided_slice %8 {offsets = [16, 0], sizes = [16, 128], strides = [1, 1]} : vector<32x128xf32> to vector<16x128xf32>
    %33 = vector.extract_strided_slice %9 {offsets = [16, 0], sizes = [16, 128], strides = [1, 1]} : vector<32x128xf32> to vector<16x128xf32>
    %34 = vector.extract_strided_slice %10 {offsets = [16, 0], sizes = [16, 128], strides = [1, 1]} : vector<32x128xf32> to vector<16x128xf32>
    %35 = vector.extract_strided_slice %11 {offsets = [16, 0], sizes = [16, 128], strides = [1, 1]} : vector<32x128xf32> to vector<16x128xf32>
    %36 = tpu.concatenate %27, %28, %29, %30, %31, %32, %33, %34, %35 in 0 : vector<16x128xf32>, vector<16x128xf32>, vector<16x128xf32>, vector<16x128xf32>, vector<16x128xf32>, vector<16x128xf32>, vector<16x128xf32>, vector<16x128xf32>, vector<16x128xf32> -> vector<144x128xf32>
    %cst_9 = arith.constant dense<0.000000e+00> : vector<8x128xf32>
    %37 = tpu.matmul %2, %36, %cst_9 {dimension_numbers = #tpu.dot_dimension_numbers<[1], [0], [0], [1], [0, 0, 1, 1], [], []>} : vector<8x144xf32>, vector<144x128xf32>, vector<8x128xf32> -> vector<8x128xf32>
    %38 = arith.addf %37, %3 : vector<8x128xf32>
    %c0_10 = arith.constant 0 : index
    %c0_11 = arith.constant 0 : index
    %c128 = arith.constant 128 : index
    %39 = vector.load %arg5[%c0_10, %c0_11, %c128] : memref<1x8x256xf32, #tpu.memory_space<vmem>>, vector<1x8x128xf32>
    %40 = vector.shape_cast %39 : vector<1x8x128xf32> to vector<8x128xf32>
    %41 = vector.shape_cast %38 : vector<8x128xf32> to vector<1x8x128xf32>
    tpu.vector_store %arg5[%c0_10, %c0_11, %c128], %41 {strides = array<i32>} : memref<1x8x256xf32, #tpu.memory_space<vmem>>, vector<1x8x128xf32>,
    return
  }
  func.func @transform_0(%arg0: i32, %arg1: i32) -> (i32, i32, i32) {
    %c0_i32 = arith.constant 0 : i32
    %c0_i32_0 = arith.constant 0 : i32
    return %arg0, %arg1, %c0_i32 : i32, i32, i32
  }
  func.func @transform_1(%arg0: i32, %arg1: i32) -> (i32, i32) {
    %c0_i32 = arith.constant 0 : i32
    %c0_i32_0 = arith.constant 0 : i32
    %c0_i32_1 = arith.constant 0 : i32
    return %c0_i32, %c0_i32_0 : i32, i32
  }
  func.func @transform_2(%arg0: i32, %arg1: i32) -> (i32, i32) {
    %c0_i32 = arith.constant 0 : i32
    %c0_i32_0 = arith.constant 0 : i32
    %c0_i32_1 = arith.constant 0 : i32
    return %c0_i32, %c0_i32_0 : i32, i32
  }
  func.func @transform_3(%arg0: i32, %arg1: i32) -> (i32, i32, i32) {
    %c0_i32 = arith.constant 0 : i32
    %c0_i32_0 = arith.constant 0 : i32
    return %arg0, %c0_i32, %arg1 : i32, i32, i32
  }
}

</mosaic_0001>

<bundles_post_ra>
// kernel: mean_pool_conv_forward.1
= control target key start
LH: loop header
LB: loop body
LE: loop exit
PB: predicated region body
PF: predicated region fallthrough
CT: control target
= control target key end

     0   :  { %s784_s12 = smov 0   ;;  %s786_s13 = smov 0   ;;  %s892_s0 = inlined_call_operand.vmem [shape: f32[2,64,128], index: 0, kind: input, shape index: {}]   ;;  %s893_s1 = inlined_call_operand.vmem [shape: f32[8,144], index: 1, kind: input, shape index: {}]   ;;  %s894_s2 = inlined_call_operand.vmem [shape: f32[8,128], index: 2, kind: input, shape index: {}]   ;;  %s895_s3 = inlined_call_operand.vmem [shape: f32[2,8,512], index: 3, kind: output, shape index: {}]  }
   0x1   :  { %s788_s14 = smov 0   ;;  %s790_s15 = smov 0  }
   0x2   :  { %s792_s16 = smov 0  }
   0x3 LB: > { %s22_s17 = sadd.s32 1, %s745_s14  ;;  %s25_s18 = sadd.s32 1, %s749_s15  ;;  %s753_s16 = sphi %s792_s16, %s13_s16   ;;  %s749_s15 = sphi %s790_s15, %s899_s15   ;;  %s745_s14 = sphi %s788_s14, %s898_s14   ;;  %s741_s13 = sphi %s786_s13, %s897_s13   ;;  %s737_s12 = sphi %s784_s12, %s896_s12  }
   0x4   : > { %p23_p0 = scmp.ge.s32.totalorder %s22_s17, 2  ;;  %p521_p1 = scmp.ge.s32.totalorder %s753_s16, 1 }
   0x5   : > { %p158_p2 = scmp.lt.s32.totalorder %s753_s16, 5 }
   0x6   : > { %s901_s17 = smov (%p23_p0, %s22_s17), 0  ;;  %s903_s18 = smov (!%p23_p0, %s25_s18), %s749_s15 }
   0x7   : > { %p159_p3 = pnand %p521_p1, %p158_p2  ;;  %p27_p4 = scmp.ge.s32.totalorder %s903_s18, 2 }
   0x8   : > { %s522_s19 = sshll.u32 (!%p159_p3), %s737_s12, 2  ;;  %p191_p5 = scmp.lt.s32.totalorder (!%p159_p3), %s741_s13, 1  ;;  %v755_v0 = vmov (!%p159_p3), 0.0|0.0   ;;  %v215_v9 = vld [vmem:[%s893_s1 + $0x8] sm:$0xff] (!%p159_p3)  ;;  %vm281_vm0 = vcmask (!%p159_p3), 130048  }
   0x9   : > { %s905_s18 = smov (%p27_p4, %s903_s18), 0  ;;  %162 = sbr.rel (%p159_p3) target bundleno = 397 (0x18d), region = 32 }
   0xa   : > { %p193_p6 = scmp.lt.s32.totalorder (!%p159_p3), %s522_s19, 7  ;;  %532 = vmatprep.subr.bf16.mxu0 (!%p159_p3), %v755_v0  ;;  %559 = vmatprep.subr.bf16.mxu1 (!%p159_p3), %v755_v0  ;;  %s756_s26 = smov (!%p159_p3), 11  }
   0xb   : > { %s757_s27 = smov (!%p159_p3), 10   ;;  %s758_s28 = smov (!%p159_p3), 9   ;;  %528 = vmatprep.mubr.msk.f32.mxu0 (!%p159_p3), %vm281_vm0, %v215_v9  ;;  %529 = vmatprep.mubr.msk.f32.mxu1 (!%p159_p3), %vm281_vm0, %v215_v9 }
   0xc   : > { %s759_s29 = smov (!%p159_p3), 1   ;;  %s760_s30 = smov (!%p159_p3), 127  }
   0xd   : > { %s761_s4 = smov (!%p159_p3), 119   ;;  %s762_s5 = smov (!%p159_p3), 118  }
   0xe   : > { %s763_s8 = smov (!%p159_p3), 117   ;;  %s525_s11 = sshll.u32 (!%p159_p3), %s737_s12, 1 }
   0xf   : > { %p203_p7 = scmp.lt.s32.totalorder (!%p159_p3), %s525_s11, 3 }
  0x10   : > { %s907_s13 = smov (!%p191_p5, %s741_s13), 1  ;;  %s909_s19 = smov (!%p193_p6, %s522_s19), 7 }
  0x11   : > { %s523_s20 = sshll.u32 %s907_s13, 3  ;;  %s911_s11 = smov (!%p203_p7, %s525_s11), 3 }
  0x12   : > { %s196_s21 = sadd.s32 %s523_s20, %s909_s19  ;;  %s526_s19 = sshll.u32 %s907_s13, 2 }
  0x13   : > { %s524_s22 = sshll.u32 %s196_s21, 3  ;;  %s206_s20 = sadd.s32 %s526_s19, %s911_s11 }
  0x14   : > { %s198_s25 = scalar_lea.vmem %s892_s0, %s524_s22  ;;  %s527_s21 = sshll.u32 %s206_s20, 3 }
  0x15   : > { %v825_v1 = vld [vmem:[%s198_s25] sm:$0xff]  ;;  %v827_v2 = vld [vmem:[%s198_s25 + $0x8] sm:$0xff]  ;;  %v829_v3 = vld [vmem:[%s198_s25 + $0x10] sm:$0xff] }
  0x16   : > { %v635_v4 = vpack.i.bf16 %v827_v2, %v825_v1  ;;  %v833_v5 = vld [vmem:[%s198_s25 + $0x18] sm:$0xff]  ;;  %v545_v7 = vpack.c.bf16 %v827_v2, %v825_v1 }
  0x17   : > { %v640_v6 = vpack.i.bf16 %v833_v5, %v829_v3  ;;  %v572_v8 = vpack.c.bf16 %v833_v5, %v829_v3 }
  0x18   : > { %636 = vrot.lane.b32.xlu0 %v635_v4, %s756_s26  ;;  %646 = vrot.lane.b32.xlu1 %v635_v4, %s757_s27 }
  0x1c   : > { %641 = vrot.lane.b32.xlu0 %v640_v6, %s756_s26  ;;  %651 = vrot.lane.b32.xlu1 %v640_v6, %s757_s27  ;;  %s208_s26 = scalar_lea.vmem %s895_s3, %s527_s21 }
  0x20   : > { %656 = vrot.lane.b32.xlu0 %v635_v4, %s758_s28  ;;  %661 = vrot.lane.b32.xlu1 %v640_v6, %s758_s28 }
  0x24   : > { %666 = vrot.lane.b32.xlu0 %v635_v4, %s759_s29  ;;  %671 = vrot.lane.b32.xlu1 %v640_v6, %s759_s29 }
  0x28   : > { %676 = vrot.lane.b32.xlu0 %v635_v4, %s760_s30  ;;  %681 = vrot.lane.b32.xlu1 %v640_v6, %s760_s30 }
  0x2c   : > { %686 = vrot.lane.b32.xlu0 %v635_v4, %s761_s4  ;;  %691 = vrot.lane.b32.xlu1 %v640_v6, %s761_s4 }
  0x30   : > { %696 = vrot.lane.b32.xlu0 %v635_v4, %s762_s5  ;;  %701 = vrot.lane.b32.xlu1 %v640_v6, %s762_s5 }
  0x34   : > { %706 = vrot.lane.b32.xlu0 %v635_v4, %s763_s8  ;;  %711 = vrot.lane.b32.xlu1 %v640_v6, %s763_s8 }
  0x8a   : > { %v637_v10 = vpop.permute.xlu0 %636  ;;  %v647_v11 = vpop.permute.xlu1 %646 }
  0x8b   : > { %v639_v12 = vunpack.i.h.bf16 %v637_v10  ;;  %v638_v13 = vunpack.i.l.bf16 %v637_v10  ;;  %v649_v14 = vunpack.i.h.bf16 %v647_v11  ;;  %v648_v15 = vunpack.i.l.bf16 %v647_v11  ;;  %v214_v11 = vld [vmem:[%s893_s1] sm:$0xff] }
  0x8d   : > { %v533_v16 = vpack.c.bf16 %v639_v12, %v638_v13  ;;  %v536_v17 = vpack.c.bf16 %v649_v14, %v648_v15  ;;  %v216_v12 = vld [vmem:[%s894_s2] sm:$0xff] }
  0x8e   : > { %v642_v18 = vpop.permute.xlu0 %641  ;;  %v652_v19 = vpop.permute.xlu1 %651 }
  0x8f   : > { %v644_v20 = vunpack.i.h.bf16 %v642_v18  ;;  %v643_v21 = vunpack.i.l.bf16 %v642_v18  ;;  %534 = vmatpush1.bf16.msra.mxu0 %v533_v16  ;;  %v654_v22 = vunpack.i.h.bf16 %v652_v19  ;;  %v653_v23 = vunpack.i.l.bf16 %v652_v19 }
  0x90   : > { %535 = vmatprep.subr.bf16.mxu0 %v755_v0 }
  0x91   : > { %v560_v24 = vpack.c.bf16 %v644_v20, %v643_v21  ;;  %v563_v25 = vpack.c.bf16 %v654_v22, %v653_v23 }
  0x92   : > { %v657_v26 = vpop.permute.xlu0 %656  ;;  %v662_v27 = vpop.permute.xlu1 %661 }
  0x93   : > { %537 = vmatpush1.bf16.msra.mxu0 %v536_v17  ;;  %561 = vmatpush1.bf16.msra.mxu1 %v560_v24  ;;  %v659_v28 = vunpack.i.h.bf16 %v657_v26  ;;  %v658_v29 = vunpack.i.l.bf16 %v657_v26  ;;  %v664_v30 = vunpack.i.h.bf16 %v662_v27  ;;  %v663_v31 = vunpack.i.l.bf16 %v662_v27 }
  0x94   : > { %562 = vmatprep.subr.bf16.mxu1 %v755_v0  ;;  %538 = vmatprep.subr.bf16.mxu0 %v755_v0 }
  0x95   : > { %v539_v32 = vpack.c.bf16 %v659_v28, %v658_v29  ;;  %v566_v33 = vpack.c.bf16 %v664_v30, %v663_v31 }
  0x96   : > { %v667_v34 = vpop.permute.xlu0 %666  ;;  %v672_v35 = vpop.permute.xlu1 %671 }
  0x97   : > { %564 = vmatpush1.bf16.msra.mxu1 %v563_v25  ;;  %v669_v36 = vunpack.i.h.bf16 %v667_v34  ;;  %v668_v37 = vunpack.i.l.bf16 %v667_v34  ;;  %v674_v38 = vunpack.i.h.bf16 %v672_v35  ;;  %v673_v39 = vunpack.i.l.bf16 %v672_v35  ;;  %540 = vmatpush1.bf16.msra.mxu0 %v539_v32 }
  0x98   : > { %565 = vmatprep.subr.bf16.mxu1 %v755_v0  ;;  %541 = vmatprep.subr.bf16.mxu0 %v755_v0 }
  0x99   : > { %v542_v40 = vpack.c.bf16 %v669_v36, %v668_v37  ;;  %v569_v43 = vpack.c.bf16 %v674_v38, %v673_v39 }
  0x9a   : > { %v677_v41 = vpop.permute.xlu0 %676  ;;  %v682_v42 = vpop.permute.xlu1 %681 }
  0x9b   : > { %567 = vmatpush1.bf16.msra.mxu1 %v566_v33  ;;  %543 = vmatpush1.bf16.msra.mxu0 %v542_v40  ;;  %v679_v44 = vunpack.i.h.bf16 %v677_v41  ;;  %v678_v45 = vunpack.i.l.bf16 %v677_v41  ;;  %v684_v46 = vunpack.i.h.bf16 %v682_v42  ;;  %v683_v50 = vunpack.i.l.bf16 %v682_v42 }
  0x9c   : > { %568 = vmatprep.subr.bf16.mxu1 %v755_v0  ;;  %544 = vmatprep.subr.bf16.mxu0 %v755_v0 }
  0x9d   : > { %v548_v49 = vpack.c.bf16 %v679_v44, %v678_v45  ;;  %v575_v57 = vpack.c.bf16 %v684_v46, %v683_v50 }
  0x9e   : > { %v687_v47 = vpop.permute.xlu0 %686  ;;  %v692_v48 = vpop.permute.xlu1 %691 }
  0x9f   : > { %570 = vmatpush1.bf16.msra.mxu1 %v569_v43  ;;  %546 = vmatpush1.bf16.msra.mxu0 %v545_v7  ;;  %v689_v51 = vunpack.i.h.bf16 %v687_v47  ;;  %v688_v52 = vunpack.i.l.bf16 %v687_v47  ;;  %v694_v53 = vunpack.i.h.bf16 %v692_v48  ;;  %v693_v54 = vunpack.i.l.bf16 %v692_v48 }
  0xa0   : > { %571 = vmatprep.subr.bf16.mxu1 %v755_v0  ;;  %547 = vmatprep.subr.bf16.mxu0 %v755_v0 }
  0xa1   : > { %v551_v58 = vpack.c.bf16 %v689_v51, %v688_v52  ;;  %v578_v61 = vpack.c.bf16 %v694_v53, %v693_v54 }
  0xa2   : > { %v697_v55 = vpop.permute.xlu0 %696  ;;  %v702_v56 = vpop.permute.xlu1 %701 }
  0xa3   : > { %573 = vmatpush1.bf16.msra.mxu1 %v572_v8  ;;  %549 = vmatpush1.bf16.msra.mxu0 %v548_v49  ;;  %v699_v59 = vunpack.i.h.bf16 %v697_v55  ;;  %v698_v60 = vunpack.i.l.bf16 %v697_v55  ;;  %v704_v62 = vunpack.i.h.bf16 %v702_v56  ;;  %v703_v2 = vunpack.i.l.bf16 %v702_v56 }
  0xa4   : > { %574 = vmatprep.subr.bf16.mxu1 %v755_v0  ;;  %550 = vmatprep.subr.bf16.mxu0 %v755_v0 }
  0xa5   : > { %v554_v1 = vpack.c.bf16 %v699_v59, %v698_v60  ;;  %v581_v5 = vpack.c.bf16 %v704_v62, %v703_v2 }
  0xa6   : > { %v707_v63 = vpop.permute.xlu0 %706  ;;  %v712_v3 = vpop.permute.xlu1 %711 }
  0xa7   : > { %576 = vmatpush1.bf16.msra.mxu1 %v575_v57  ;;  %552 = vmatpush1.bf16.msra.mxu0 %v551_v58  ;;  %v709_v4 = vunpack.i.h.bf16 %v707_v63  ;;  %v708_v6 = vunpack.i.l.bf16 %v707_v63  ;;  %v714_v8 = vunpack.i.h.bf16 %v712_v3  ;;  %v713_v9 = vunpack.i.l.bf16 %v712_v3 }
  0xa8   : > { %577 = vmatprep.subr.bf16.mxu1 %v755_v0  ;;  %553 = vmatprep.subr.bf16.mxu0 %v755_v0 }
  0xa9   : > { %v557_v7 = vpack.c.bf16 %v709_v4, %v708_v6  ;;  %v584_v10 = vpack.c.bf16 %v714_v8, %v713_v9 }
  0xab   : > { %579 = vmatpush1.bf16.msra.mxu1 %v578_v61  ;;  %555 = vmatpush1.bf16.msra.mxu0 %v554_v1 }
  0xac   : > { %580 = vmatprep.subr.bf16.mxu1 %v755_v0  ;;  %556 = vmatprep.subr.bf16.mxu0 %v755_v0 }
  0xaf   : > { %582 = vmatpush1.bf16.msra.mxu1 %v581_v5  ;;  %558 = vmatpush1.bf16.msra.mxu0 %v557_v7 }
  0xb0   : > { %583 = vmatprep.subr.bf16.mxu1 %v755_v0 }
  0xb2   : > { %350 = vmatmul.mubr.f32.vlgmr.msra.gmra.mrb[0].mxu0 %v214_v11 }
  0xb3   : > { %585 = vmatpush1.bf16.msra.mxu1 %v584_v10 }
  0xb6   : > { %421 = vmatmul.mubr.f32.vlgmr.msra.gmra.mrb[0].mxu1 %v214_v11 }
 0x185   : > { %v351_v13 = vpop.f32.mrb[0].mxu0 }
 0x186   : > { %v352_v14 = vadd.f32 %v351_v13, %v216_v12  ;;  %v353_v0 = vpop.f32.mrb[1].mxu0 }
 0x188   : > { %355 = vst [vmem:[%s208_s26] sm:$0xff] %v352_v14 }
 0x189   : > { %v422_v15 = vpop.f32.mrb[0].mxu1 }
 0x18a   : > { %v423_v16 = vadd.f32 %v422_v15, %v216_v12  ;;  %v424_v17 = vpop.f32.mrb[1].mxu1 }
 0x18c   : > { %426 = vst [vmem:[%s208_s26 + $0x8] sm:$0xff] %v423_v16 }
 0x18d PF: > { %s13_s16 = sadd.s32 1, %s753_s16   ;;  %s896_s12 = smov %s745_s14 }
 0x18e   : > { %p10_p8 = scmp.ge.s32.totalorder %s13_s16, 6   ;;  %s897_s13 = smov %s749_s15 }
 0x18f   : > { %s898_s14 = smov %s901_s17  ;;  %s899_s15 = smov %s905_s18 }
 0x190   :  { %12 = sbr.rel (!%p10_p8) target bundleno = 3 (0x3), region = 62 }

</bundles_post_ra>
